<compile_context>
chip_gen: v6e
topology: v6e:2x2x1
jax: 0.10.0
libtpu: 0.0.40
codegen_flags: <defaults>
</compile_context>

<pallas_src>
import functools

import jax
import jax.numpy as jnp
from jax import lax
from jax.experimental import pallas as pl
from jax.experimental.pallas import tpu as pltpu

N_TOPICS = 40
BERT_HIDDEN = 768                       # 6 * 128 -> lane-aligned contraction dim
NUM_LABELS = 2
LDA_DIM = 2 * N_TOPICS                  # 80 (merged lda1||lda2 slab)
IN_DIM = BERT_HIDDEN + LDA_DIM          # 848
H1 = 256
H2 = 64


def _round_up(x, m):
    return (x + m - 1) // m * m


def _classifier_kernel(lda_ref, bert_ref,
                       w1l_ref, w1b_ref, b1_ref,
                       w2_ref, b2_ref,
                       w3d_ref, b3d_ref,
                       out_ref):
    """One batch tile of Linear->Tanh->Linear->Tanh->Linear->Softmax(dim=1)."""
    # In-kernel bf16 casts of the f32 streams (no separate XLA cast pass in HBM).
    bert = bert_ref[...].astype(jnp.bfloat16)        # (TB, 768)
    lda = lda_ref[...].astype(jnp.bfloat16)          # (TB, 80)

    # ---- Linear(848 -> 256): K split into [lda1|lda2] (80) and bert (768) slabs.
    h1 = jnp.dot(bert, w1b_ref[...], preferred_element_type=jnp.float32)
    h1 = h1 + jnp.dot(lda, w1l_ref[...], preferred_element_type=jnp.float32)
    h1 = jnp.tanh(h1 + b1_ref[...])                  # (TB, 256) f32

    # ---- Linear(256 -> 64) + Tanh  (bf16 operands, f32 accumulation)
    h2 = jnp.dot(h1.astype(jnp.bfloat16), w2_ref[...],
                 preferred_element_type=jnp.float32)
    h2 = jnp.tanh(h2 + b2_ref[...])                  # (TB, 64) f32

    # ---- Linear(64 -> 2) + 2-class softmax, folded into a single diff vector:
    #      softmax(l)[1] == sigmoid(l1 - l0),  l1 - l0 == h2 @ (w3[:,1]-w3[:,0]) + (b3[1]-b3[0])
    diff = jnp.dot(h2, w3d_ref[...], preferred_element_type=jnp.float32) + b3d_ref[...]
    p1 = 0.5 * (jnp.tanh(0.5 * diff) + 1.0)          # overflow-safe sigmoid via EUP tanh
    col = lax.broadcasted_iota(jnp.int32, out_ref.shape, 1)
    out_ref[...] = jnp.where(col == 1, p1, 1.0 - p1)  # (TB, 2)


@functools.partial(jax.jit, static_argnames=("block_b",))
def tbert_classifier(lda1, lda2, bert_cls, w1, b1, w2, b2, w3, b3, *,
                     block_b=1024):
    """Fused classifier head.  lda1/lda2: (B,40), bert_cls: (B,768), f32 in."""
    B = lda1.shape[0]
    assert lda1.shape == (B, N_TOPICS) and lda2.shape == (B, N_TOPICS)
    assert bert_cls.shape == (B, BERT_HIDDEN)
    assert w1.shape == (IN_DIM, H1) and w2.shape == (H1, H2)
    assert w3.shape == (H2, NUM_LABELS)

    # Streamed activations stay f32 straight from the producers; the only
    # wrapper-side touch is the tiny (B,80) lda concat (~2.5% of bert traffic).
    lda = jnp.concatenate([lda1, lda2], axis=1).astype(jnp.float32)   # (B, 80)
    bert = bert_cls.astype(jnp.float32)                               # no-op if already f32

    # Weights: small, cast once to bf16 (resident in VMEM via constant index_maps).
    bf16 = lambda a: a.astype(jnp.bfloat16)
    w1l = bf16(w1[:LDA_DIM])            # (80, 256)
    w1b = bf16(w1[LDA_DIM:])            # (768, 256)
    w2b = bf16(w2)                      # (256, 64)
    b1f = jnp.asarray(b1, jnp.float32).reshape(1, H1)
    b2f = jnp.asarray(b2, jnp.float32).reshape(1, H2)
    w3f = jnp.asarray(w3, jnp.float32)
    b3f = jnp.asarray(b3, jnp.float32).reshape(1, NUM_LABELS)
    w3d = w3f[:, 1:2] - w3f[:, 0:1]     # (64, 1) f32 — folded final layer
    b3d = b3f[:, 1:2] - b3f[:, 0:1]     # (1, 1)  f32

    # Batch tile: >= 2 grid steps whenever B allows (v7x two-TC sharding),
    # sublane-multiple (8), capped by block_b.  Ragged last block is handled by
    # Pallas (reads past B are don't-care rows, writes past B are clipped).
    tb = max(8, min(_round_up(int(block_b), 8), _round_up(pl.cdiv(B, 2), 8)))
    grid = (pl.cdiv(B, tb),)

    batch_spec = lambda feat: pl.BlockSpec((tb, feat), lambda i: (i, 0))
    const_spec = lambda shape: pl.BlockSpec(shape, lambda i: (0, 0))

    out = pl.pallas_call(
        _classifier_kernel,
        out_shape=jax.ShapeDtypeStruct((B, NUM_LABELS), jnp.float32),
        grid=grid,
        in_specs=[
            batch_spec(LDA_DIM),             # lda1||lda2 tile (f32, streamed)
            batch_spec(BERT_HIDDEN),         # bert [CLS] tile (f32, streamed)
            const_spec((LDA_DIM, H1)),       # w1[:80]   (bf16, resident)
            const_spec((BERT_HIDDEN, H1)),   # w1[80:]   (bf16, resident)
            const_spec((1, H1)),             # b1
            const_spec((H1, H2)),            # w2
            const_spec((1, H2)),             # b2
            const_spec((H2, 1)),             # w3[:,1]-w3[:,0]
            const_spec((1, 1)),              # b3[1]-b3[0]
        ],
        out_specs=pl.BlockSpec((tb, NUM_LABELS), lambda i: (i, 0)),
        compiler_params=pltpu.CompilerParams(
            dimension_semantics=("parallel",),      # shard batch across TCs (v7x)
            vmem_limit_bytes=32 * 1024 * 1024,      # explicit; valid on v5e..v7x
        ),
    )(lda, bert, w1l, w1b, b1f, w2b, b2f, w3d, b3d)
    return out


def _linear_init(key, fan_in, fan_out):
    """Mimic torch nn.Linear default init: U(-1/sqrt(fan_in), 1/sqrt(fan_in))."""
    kw, kb = jax.random.split(key)
    bound = 1.0 / jnp.sqrt(jnp.float32(fan_in))
    w = jax.random.uniform(kw, (fan_in, fan_out), jnp.float32, -bound, bound)
    b = jax.random.uniform(kb, (1, fan_out), jnp.float32, -bound, bound)
    return w, b


if __name__ == "__main__":
    key = jax.random.PRNGKey(0)
    k_lda1, k_lda2, k_bert, k_l1, k_l2, k_l3 = jax.random.split(key, 6)

    B = 2  # small demo batch (real serving batches should be >= 512 rows)

    # TODO(synk): BertTokenizer / BertModel and sklearn LDA fit/transform are
    # external pretrained components with no Pallas equivalent; their outputs
    # (topic vectors + [CLS] embedding) are synthesized here as kernel inputs.
    lda1_raw = jax.random.uniform(k_lda1, (B, N_TOPICS), jnp.float32, 1e-3, 1.0)
    lda2_raw = jax.random.uniform(k_lda2, (B, N_TOPICS), jnp.float32, 1e-3, 1.0)
    lda1 = lda1_raw / jnp.sum(lda1_raw, axis=1, keepdims=True)
    lda2 = lda2_raw / jnp.sum(lda2_raw, axis=1, keepdims=True)
    bert_cls = jax.random.normal(k_bert, (B, BERT_HIDDEN), jnp.float32)

    w1, b1 = _linear_init(k_l1, IN_DIM, H1)
    w2, b2 = _linear_init(k_l2, H1, H2)
    w3, b3 = _linear_init(k_l3, H2, NUM_LABELS)

    out = tbert_classifier(lda1, lda2, bert_cls, w1, b1, w2, b2, w3, b3)
    out = jax.block_until_ready(out)

    # Reference in plain JAX mirroring the kernel's precision choices
    # (bf16 operands for the two big matmuls, f32 for the tiny final layer).
    rnd = lambda a: a.astype(jnp.bfloat16).astype(jnp.float32)
    x = jnp.concatenate([lda1, lda2, bert_cls], axis=1)
    h1 = jnp.tanh(rnd(x) @ rnd(w1) + b1)
    h2 = jnp.tanh(rnd(h1) @ rnd(w2) + b2)
    logits = h2 @ w3 + b3
    ref = jax.nn.softmax(logits, axis=1)

    assert out.shape == (B, NUM_LABELS)
    assert bool(jnp.allclose(out, ref, atol=2e-3, rtol=2e-3)), (out, ref)
    assert bool(jnp.allclose(jnp.sum(out, axis=1), 1.0, atol=1e-5))

    print("KERNEL_OK")
</pallas_src>

<mosaic_0001>
module attributes {stable_mosaic.version = 11 : i64} {
  func.func @_classifier_kernel(%arg0: i32, %arg1: memref<8x80xf32, #tpu.memory_space<vmem>>, %arg2: memref<8x768xf32, #tpu.memory_space<vmem>>, %arg3: memref<80x256xbf16, #tpu.memory_space<vmem>>, %arg4: memref<768x256xbf16, #tpu.memory_space<vmem>>, %arg5: memref<1x256xf32, #tpu.memory_space<vmem>>, %arg6: memref<256x64xbf16, #tpu.memory_space<vmem>>, %arg7: memref<1x64xf32, #tpu.memory_space<vmem>>, %arg8: memref<64x1xf32, #tpu.memory_space<vmem>>, %arg9: memref<1x1xf32, #tpu.memory_space<vmem>>, %arg10: memref<8x2xf32, #tpu.memory_space<vmem>>) attributes {dimension_semantics = [#tpu.dimension_semantics<parallel>], iteration_bounds = array<i64: 1>, scalar_prefetch = 0 : i64, scratch_operands = 0 : i64, tpu.core_type = #tpu.core_type<tc>, window_params = [{transform_indices = @transform_0, window_bounds = array<i64: 8, 80>}, {transform_indices = @transform_1, window_bounds = array<i64: 8, 768>}, {pipeline_mode = #tpu.pipeline_mode<synchronous>, transform_indices = @transform_2, window_bounds = array<i64: 80, 256>}, {pipeline_mode = #tpu.pipeline_mode<synchronous>, transform_indices = @transform_3, window_bounds = array<i64: 768, 256>}, {pipeline_mode = #tpu.pipeline_mode<synchronous>, transform_indices = @transform_4, window_bounds = array<i64: 1, 256>}, {pipeline_mode = #tpu.pipeline_mode<synchronous>, transform_indices = @transform_5, window_bounds = array<i64: 256, 64>}, {pipeline_mode = #tpu.pipeline_mode<synchronous>, transform_indices = @transform_6, window_bounds = array<i64: 1, 64>}, {pipeline_mode = #tpu.pipeline_mode<synchronous>, transform_indices = @transform_7, window_bounds = array<i64: 64, 1>}, {pipeline_mode = #tpu.pipeline_mode<synchronous>, transform_indices = @transform_8, window_bounds = array<i64: 1, 1>}, {transform_indices = @transform_9, window_bounds = array<i64: 8, 2>}]} {
    %c0 = arith.constant 0 : index
    %c0_0 = arith.constant 0 : index
    %0 = vector.load %arg2[%c0, %c0_0] : memref<8x768xf32, #tpu.memory_space<vmem>>, vector<8x768xf32>
    %1 = arith.truncf %0 : vector<8x768xf32> to vector<8x768xbf16>
    %c0_1 = arith.constant 0 : index
    %c0_2 = arith.constant 0 : index
    %2 = vector.load %arg1[%c0_1, %c0_2] : memref<8x80xf32, #tpu.memory_space<vmem>>, vector<8x80xf32>
    %3 = arith.truncf %2 : vector<8x80xf32> to vector<8x80xbf16>
    %c0_3 = arith.constant 0 : index
    %c0_4 = arith.constant 0 : index
    %4 = vector.load %arg4[%c0_3, %c0_4] : memref<768x256xbf16, #tpu.memory_space<vmem>>, vector<768x256xbf16>
    %cst = arith.constant dense<0.000000e+00> : vector<8x256xf32>
    %5 = tpu.matmul %1, %4, %cst {dimension_numbers = #tpu.dot_dimension_numbers<[1], [0], [0], [1], [0, 0, 1, 1], [], []>} : vector<8x768xbf16>, vector<768x256xbf16>, vector<8x256xf32> -> vector<8x256xf32>
    %c0_5 = arith.constant 0 : index
    %c0_6 = arith.constant 0 : index
    %6 = vector.load %arg3[%c0_5, %c0_6] : memref<80x256xbf16, #tpu.memory_space<vmem>>, vector<80x256xbf16>
    %cst_7 = arith.constant dense<0.000000e+00> : vector<8x256xf32>
    %7 = tpu.matmul %3, %6, %cst_7 {dimension_numbers = #tpu.dot_dimension_numbers<[1], [0], [0], [1], [0, 0, 1, 1], [], []>} : vector<8x80xbf16>, vector<80x256xbf16>, vector<8x256xf32> -> vector<8x256xf32>
    %8 = arith.addf %5, %7 : vector<8x256xf32>
    %c0_8 = arith.constant 0 : index
    %c0_9 = arith.constant 0 : index
    %9 = vector.load %arg5[%c0_8, %c0_9] : memref<1x256xf32, #tpu.memory_space<vmem>>, vector<1x256xf32>
    %10 = vector.broadcast %9 : vector<1x256xf32> to vector<8x256xf32>
    %11 = arith.addf %8, %10 : vector<8x256xf32>
    %12 = math.tanh %11 : vector<8x256xf32>
    %13 = arith.truncf %12 : vector<8x256xf32> to vector<8x256xbf16>
    %c0_10 = arith.constant 0 : index
    %c0_11 = arith.constant 0 : index
    %14 = vector.load %arg6[%c0_10, %c0_11] : memref<256x64xbf16, #tpu.memory_space<vmem>>, vector<256x64xbf16>
    %cst_12 = arith.constant dense<0.000000e+00> : vector<8x64xf32>
    %15 = tpu.matmul %13, %14, %cst_12 {dimension_numbers = #tpu.dot_dimension_numbers<[1], [0], [0], [1], [0, 0, 1, 1], [], []>} : vector<8x256xbf16>, vector<256x64xbf16>, vector<8x64xf32> -> vector<8x64xf32>
    %c0_13 = arith.constant 0 : index
    %c0_14 = arith.constant 0 : index
    %16 = vector.load %arg7[%c0_13, %c0_14] : memref<1x64xf32, #tpu.memory_space<vmem>>, vector<1x64xf32>
    %17 = vector.broadcast %16 : vector<1x64xf32> to vector<8x64xf32>
    %18 = arith.addf %15, %17 : vector<8x64xf32>
    %19 = math.tanh %18 : vector<8x64xf32>
    %c0_15 = arith.constant 0 : index
    %c0_16 = arith.constant 0 : index
    %20 = vector.load %arg8[%c0_15, %c0_16] : memref<64x1xf32, #tpu.memory_space<vmem>>, vector<64x1xf32>
    %cst_17 = arith.constant dense<0.000000e+00> : vector<8x1xf32>
    %21 = tpu.matmul %19, %20, %cst_17 {dimension_numbers = #tpu.dot_dimension_numbers<[1], [0], [0], [1], [0, 0, 1, 1], [], []>} : vector<8x64xf32>, vector<64x1xf32>, vector<8x1xf32> -> vector<8x1xf32>
    %c0_18 = arith.constant 0 : index
    %c0_19 = arith.constant 0 : index
    %22 = vector.load %arg9[%c0_18, %c0_19] : memref<1x1xf32, #tpu.memory_space<vmem>>, vector<1x1xf32>
    %23 = vector.broadcast %22 : vector<1x1xf32> to vector<8x1xf32>
    %24 = arith.addf %21, %23 : vector<8x1xf32>
    %cst_20 = arith.constant 5.000000e-01 : f32
    %25 = vector.broadcast %cst_20 : f32 to vector<8x1xf32>
    %26 = arith.mulf %25, %24 : vector<8x1xf32>
    %27 = math.tanh %26 : vector<8x1xf32>
    %cst_21 = arith.constant 1.000000e+00 : f32
    %28 = vector.broadcast %cst_21 : f32 to vector<8x1xf32>
    %29 = arith.addf %27, %28 : vector<8x1xf32>
    %cst_22 = arith.constant 5.000000e-01 : f32
    %30 = vector.broadcast %cst_22 : f32 to vector<8x1xf32>
    %31 = arith.mulf %30, %29 : vector<8x1xf32>
    %32 = tpu.iota {dimensions = array<i32: 1>} : vector<8x2xi32>
    %c1_i32 = arith.constant 1 : i32
    %33 = vector.broadcast %c1_i32 : i32 to vector<8x2xi32>
    %34 = arith.cmpi eq, %32, %33 : vector<8x2xi32>
    %cst_23 = arith.constant 1.000000e+00 : f32
    %35 = vector.broadcast %cst_23 : f32 to vector<8x1xf32>
    %36 = arith.subf %35, %31 : vector<8x1xf32>
    %37 = vector.shape_cast %31 : vector<8x1xf32> to vector<8x1xf32>
    %38 = vector.broadcast %37 : vector<8x1xf32> to vector<8x2xf32>
    %39 = vector.shape_cast %36 : vector<8x1xf32> to vector<8x1xf32>
    %40 = vector.broadcast %39 : vector<8x1xf32> to vector<8x2xf32>
    %41 = arith.select %34, %38, %40 : vector<8x2xi1>, vector<8x2xf32>
    %c0_24 = arith.constant 0 : index
    %c0_25 = arith.constant 0 : index
    %42 = vector.load %arg10[%c0_24, %c0_25] : memref<8x2xf32, #tpu.memory_space<vmem>>, vector<8x2xf32>
    tpu.vector_store %arg10[%c0_24, %c0_25], %41 {strides = array<i32>} : memref<8x2xf32, #tpu.memory_space<vmem>>, vector<8x2xf32>,
    return
  }
  func.func @transform_0(%arg0: i32) -> (i32, i32) {
    %c0_i32 = arith.constant 0 : i32
    %c0_i32_0 = arith.constant 0 : i32
    return %arg0, %c0_i32 : i32, i32
  }
  func.func @transform_1(%arg0: i32) -> (i32, i32) {
    %c0_i32 = arith.constant 0 : i32
    %c0_i32_0 = arith.constant 0 : i32
    return %arg0, %c0_i32 : i32, i32
  }
  func.func @transform_2(%arg0: i32) -> (i32, i32) {
    %c0_i32 = arith.constant 0 : i32
    %c0_i32_0 = arith.constant 0 : i32
    %c0_i32_1 = arith.constant 0 : i32
    return %c0_i32, %c0_i32_0 : i32, i32
  }
  func.func @transform_3(%arg0: i32) -> (i32, i32) {
    %c0_i32 = arith.constant 0 : i32
    %c0_i32_0 = arith.constant 0 : i32
    %c0_i32_1 = arith.constant 0 : i32
    return %c0_i32, %c0_i32_0 : i32, i32
  }
  func.func @transform_4(%arg0: i32) -> (i32, i32) {
    %c0_i32 = arith.constant 0 : i32
    %c0_i32_0 = arith.constant 0 : i32
    %c0_i32_1 = arith.constant 0 : i32
    return %c0_i32, %c0_i32_0 : i32, i32
  }
  func.func @transform_5(%arg0: i32) -> (i32, i32) {
    %c0_i32 = arith.constant 0 : i32
    %c0_i32_0 = arith.constant 0 : i32
    %c0_i32_1 = arith.constant 0 : i32
    return %c0_i32, %c0_i32_0 : i32, i32
  }
  func.func @transform_6(%arg0: i32) -> (i32, i32) {
    %c0_i32 = arith.constant 0 : i32
    %c0_i32_0 = arith.constant 0 : i32
    %c0_i32_1 = arith.constant 0 : i32
    return %c0_i32, %c0_i32_0 : i32, i32
  }
  func.func @transform_7(%arg0: i32) -> (i32, i32) {
    %c0_i32 = arith.constant 0 : i32
    %c0_i32_0 = arith.constant 0 : i32
    %c0_i32_1 = arith.constant 0 : i32
    return %c0_i32, %c0_i32_0 : i32, i32
  }
  func.func @transform_8(%arg0: i32) -> (i32, i32) {
    %c0_i32 = arith.constant 0 : i32
    %c0_i32_0 = arith.constant 0 : i32
    %c0_i32_1 = arith.constant 0 : i32
    return %c0_i32, %c0_i32_0 : i32, i32
  }
  func.func @transform_9(%arg0: i32) -> (i32, i32) {
    %c0_i32 = arith.constant 0 : i32
    %c0_i32_0 = arith.constant 0 : i32
    return %arg0, %c0_i32 : i32, i32
  }
}

</mosaic_0001>

<bundles_post_ra>
// kernel: tbert_classifier.1
= control target key start
LH: loop header
LB: loop body
LE: loop exit
PB: predicated region body
PF: predicated region fallthrough
CT: control target
= control target key end

     0   :  { %s2144_s0 = inlined_call_operand.vmem [shape: f32[2,80], index: 0, kind: input, shape index: {}]   ;;  %s2145_s1 = inlined_call_operand.vmem [shape: f32[2,768], index: 1, kind: input, shape index: {}]   ;;  %s2146_s2 = inlined_call_operand.vmem [shape: bf16[80,256], index: 2, kind: input, shape index: {}]   ;;  %s2147_s3 = inlined_call_operand.vmem [shape: bf16[768,256], index: 3, kind: input, shape index: {}]   ;;  %s2148_s4 = inlined_call_operand.vmem [shape: f32[1,256], index: 4, kind: input, shape index: {}]   ;;  %s2149_s5 = inlined_call_operand.vmem [shape: bf16[256,64], index: 5, kind: input, shape index: {}]   ;;  %s2150_s6 = inlined_call_operand.vmem [shape: f32[1,64], index: 6, kind: input, shape index: {}]   ;;  %s2151_s7 = inlined_call_operand.vmem [shape: f32[64,1], index: 7, kind: input, shape index: {}]   ;;  %s2152_s8 = inlined_call_operand.<no memory space> [shape: f32[1,1], index: 8, kind: input, shape index: {}]   ;;  %s2153_s9 = inlined_call_operand.hbm [shape: f32[2,2], index: 9, kind: output, shape index: {}]  }
   0x1   :  { %v14_v0 = vstv %s2152_s8 }
   0x2   :  { %15 = vst [vmem:[#allocation2] sm:$0x1] %v14_v0 }
   0x3   :  { %16 = vsyncpa [#allocation4], 0  ;;  %v1428_v1 = vld [vmem:[%s2146_s2 + $0x44] ss:$8 sps:$4 sm:$0xff]   ;;  %v1641_v2 = vmov 0   ;;  %vm276_vm0 = vcmask 654336   ;;  %v59_v44 = vlaneseq }
   0x4   :  { %312 = vmatprep.mubr.bf16.mxu0 %v1641_v2  ;;  %1427 = vset.pattern.permute.xlu0 %v1641_v2  ;;  %v1430_v3 = vld [vmem:[%s2147_s3 + $0x74] ss:$8 sps:$4 sm:$0xff]   ;;  %v1432_v4 = vld [vmem:[%s2146_s2 + $0x40] ss:$8 sps:$4 sm:$0xff]   ;;  %v1433_v5 = vld [vmem:[%s2147_s3 + $0x70] ss:$8 sps:$4 sm:$0xff]  }
   0x5   :  { %286 = vmatprep.subr.bf16.mxu0 %v1428_v1  ;;  %v1434_v6 = vld [vmem:[%s2146_s2 + $0x34] ss:$8 sps:$4 sm:$0xff]   ;;  %801 = vmatprep.subr.bf16.mxu1 %v1430_v3  ;;  %v1436_v7 = vld [vmem:[%s2147_s3 + $0x64] ss:$8 sps:$4 sm:$0xff]   ;;  %v1438_v8 = vld [vmem:[%s2146_s2 + $0x30] ss:$8 sps:$4 sm:$0xff]  }
   0x6   :  { %287 = vmatpush1.bf16.msra.mxu0 %v1432_v4  ;;  %802 = vmatpush1.bf16.msra.mxu1 %v1433_v5  ;;  %v1439_v9 = vld [vmem:[%s2147_s3 + $0x60] ss:$8 sps:$4 sm:$0xff]   ;;  %v1440_v10 = vld [vmem:[%s2146_s2 + $0x24] ss:$8 sps:$4 sm:$0xff]   ;;  %v1442_v11 = vld [vmem:[%s2147_s3 + $0x54] ss:$8 sps:$4 sm:$0xff]  }
   0x7   :  { %288 = vmatprep.subr.bf16.mxu0 %v1434_v6  ;;  %803 = vmatprep.subr.bf16.mxu1 %v1436_v7  ;;  %v1444_v12 = vld [vmem:[%s2146_s2 + $0x20] ss:$8 sps:$4 sm:$0xff]   ;;  %v1445_v13 = vld [vmem:[%s2147_s3 + $0x50] ss:$8 sps:$4 sm:$0xff]   ;;  %v1446_v14 = vld [vmem:[%s2146_s2 + $0x14] ss:$8 sps:$4 sm:$0xff]  }
   0x8   :  { %v1448_v15 = vld [vmem:[%s2147_s3 + $0x44] ss:$8 sps:$4 sm:$0xff]   ;;  %v1450_v16 = vld [vmem:[%s2146_s2 + $0x10] ss:$8 sps:$4 sm:$0xff]   ;;  %v1451_v17 = vld [vmem:[%s2147_s3 + $0x40] ss:$8 sps:$4 sm:$0xff]  }
   0x9   :  { %v1452_v18 = vld [vmem:[%s2146_s2 + $0x4] ss:$8 sps:$4 sm:$0xff]   ;;  %v1454_v19 = vld [vmem:[%s2147_s3 + $0x34] ss:$8 sps:$4 sm:$0xff]   ;;  %v1456_v20 = vld [vmem:[%s2146_s2] ss:$8 sps:$4 sm:$0xff]  }
   0xa   :  { %289 = vmatpush1.bf16.msra.mxu0 %v1438_v8  ;;  %804 = vmatpush1.bf16.msra.mxu1 %v1439_v9  ;;  %v1457_v21 = vld [vmem:[%s2147_s3 + $0x30] ss:$8 sps:$4 sm:$0xff]   ;;  %v118_v22 = vld [vmem:[%s2144_s0] sm:$0xff]  ;;  %v1462_v23 = vld [vmem:[%s2147_s3 + $0x174] ss:$8 sps:$4 sm:$0xff]   ;;  %v1831_v50 = vshrl.u32 %v59_v44, 7 }
   0xb   :  { %290 = vmatprep.subr.bf16.mxu0 %v1440_v10  ;;  %805 = vmatprep.subr.bf16.mxu1 %v1442_v11  ;;  %v1458_v24 = vld [vmem:[%s2147_s3 + $0x24] ss:$8 sps:$4 sm:$0xff]   ;;  %v119_v25 = vpack.c.bf16 %v118_v22, %v118_v22  ;;  %v1460_v26 = vld [vmem:[%s2147_s3 + $0x170] ss:$8 sps:$4 sm:$0xff]   ;;  %v1463_v27 = vld [vmem:[%s2147_s3 + $0x20] ss:$8 sps:$4 sm:$0xff]  }
   0xc   :  { %v1468_v28 = vld [vmem:[%s2147_s3 + $0x164] ss:$8 sps:$4 sm:$0xff]   ;;  %v1464_v29 = vld [vmem:[%s2147_s3 + $0x14] ss:$8 sps:$4 sm:$0xff]   ;;  %v1466_v30 = vld [vmem:[%s2147_s3 + $0x160] ss:$8 sps:$4 sm:$0xff]  }
   0xd   :  { %v1469_v31 = vld [vmem:[%s2147_s3 + $0x10] ss:$8 sps:$4 sm:$0xff]   ;;  %v1474_v32 = vld [vmem:[%s2147_s3 + $0x154] ss:$8 sps:$4 sm:$0xff]   ;;  %v1470_v33 = vld [vmem:[%s2147_s3 + $0x4] ss:$8 sps:$4 sm:$0xff]  }
   0xe   :  { %291 = vmatpush1.bf16.msra.mxu0 %v1444_v12  ;;  %806 = vmatpush1.bf16.msra.mxu1 %v1445_v13  ;;  %v1472_v34 = vld [vmem:[%s2147_s3 + $0x150] ss:$8 sps:$4 sm:$0xff]   ;;  %v1475_v35 = vld [vmem:[%s2147_s3] ss:$8 sps:$4 sm:$0xff]   ;;  %v1480_v36 = vld [vmem:[%s2147_s3 + $0x144] ss:$8 sps:$4 sm:$0xff]  }
   0xf   :  { %292 = vmatprep.subr.bf16.mxu0 %v1446_v14  ;;  %807 = vmatprep.subr.bf16.mxu1 %v1448_v15  ;;  %v1476_v37 = vld [vmem:[%s2147_s3 + $0xf4] ss:$8 sps:$4 sm:$0xff]   ;;  %v1478_v38 = vld [vmem:[%s2147_s3 + $0x140] ss:$8 sps:$4 sm:$0xff]   ;;  %v1481_v39 = vld [vmem:[%s2147_s3 + $0xf0] ss:$8 sps:$4 sm:$0xff]  }
  0x10   :  { %v1486_v40 = vld [vmem:[%s2147_s3 + $0x134] ss:$8 sps:$4 sm:$0xff]   ;;  %v1482_v41 = vld [vmem:[%s2147_s3 + $0xe4] ss:$8 sps:$4 sm:$0xff]   ;;  %v1642_v42 = vmov 1983009808  }
  0x11   :  { %v57_v43 = vunpack.c.l.s4 %v1642_v42  ;;  %v1484_v45 = vld [vmem:[%s2147_s3 + $0x130] ss:$8 sps:$4 sm:$0xff]   ;;  %v1487_v46 = vld [vmem:[%s2147_s3 + $0xe0] ss:$8 sps:$4 sm:$0xff]   ;;  %v1492_v47 = vld [vmem:[%s2147_s3 + $0x124] ss:$8 sps:$4 sm:$0xff]  }
  0x12   :  { %293 = vmatpush1.bf16.msra.mxu0 %v1450_v16  ;;  %808 = vmatpush1.bf16.msra.mxu1 %v1451_v17  ;;  %v1488_v48 = vld [vmem:[%s2147_s3 + $0xd4] ss:$8 sps:$4 sm:$0xff]   ;;  %v1490_v51 = vld [vmem:[%s2147_s3 + $0x120] ss:$8 sps:$4 sm:$0xff]   ;;  %v1493_v52 = vld [vmem:[%s2147_s3 + $0xd0] ss:$8 sps:$4 sm:$0xff]  }
  0x13   :  { %294 = vmatprep.subr.bf16.mxu0 %v1452_v18  ;;  %809 = vmatprep.subr.bf16.mxu1 %v1454_v19  ;;  %v58_v49 = vunpack.c.0.s8 %v57_v43  ;;  %v1498_v53 = vld [vmem:[%s2147_s3 + $0x114] ss:$8 sps:$4 sm:$0xff]   ;;  %v1494_v54 = vld [vmem:[%s2147_s3 + $0xc4] ss:$8 sps:$4 sm:$0xff]   ;;  %v1496_v55 = vld [vmem:[%s2147_s3 + $0x110] ss:$8 sps:$4 sm:$0xff]  }
  0x14   :  { %v1499_v57 = vld [vmem:[%s2147_s3 + $0xc0] ss:$8 sps:$4 sm:$0xff]   ;;  %v1504_v58 = vld [vmem:[%s2147_s3 + $0x104] ss:$8 sps:$4 sm:$0xff]   ;;  %v1500_v63 = vld [vmem:[%s2147_s3 + $0xb4] ss:$8 sps:$4 sm:$0xff]  }
  0x15   :  { %v1849_v56 = vsub.s32 %v58_v49, %v1831_v50  ;;  %v1524_v59 = vld [vmem:[%s2145_s1] ss:$12 sps:$4 sm:$0xff]   ;;  %v1526_v60 = vld [vmem:[%s2145_s1 + $0x4] ss:$12 sps:$4 sm:$0xff]   ;;  %v1529_v62 = vld [vmem:[%s2145_s1 + $0x1c] ss:$12 sps:$4 sm:$0xff]  }
  0x16   :  { %295 = vmatpush1.bf16.msra.mxu0 %v1456_v20  ;;  %810 = vmatpush1.bf16.msra.mxu1 %v1457_v21  ;;  %v1527_v61 = vld [vmem:[%s2145_s1 + $0x18] ss:$12 sps:$4 sm:$0xff]   ;;  %v1502_v4 = vld [vmem:[%s2147_s3 + $0x100] ss:$8 sps:$4 sm:$0xff]   ;;  %v1510_v6 = vld [vmem:[%s2147_s3 + $0x1f4] ss:$8 sps:$4 sm:$0xff]  }
  0x17   :  { %842 = vmatprep.subr.bf16.mxu0 %v1462_v23  ;;  %811 = vmatprep.subr.bf16.mxu1 %v1458_v24  ;;  %v62_v0 = vrot.slane %v1524_v59, %v1849_v56  ;;  %v76_v1 = vrot.slane %v1527_v61, %v1849_v56  ;;  %v1875_v2 = vrot.slane %v1526_v60, %v1849_v56  ;;  %v1505_v5 = vld [vmem:[%s2147_s3 + $0xb0] ss:$8 sps:$4 sm:$0xff]   ;;  %v1506_v9 = vld [vmem:[%s2147_s3 + $0xa4] ss:$8 sps:$4 sm:$0xff]   ;;  %v1511_v13 = vld [vmem:[%s2147_s3 + $0xa0] ss:$8 sps:$4 sm:$0xff]  }
  0x18   :  { %v1878_v3 = vrot.slane %v1529_v62, %v1849_v56  ;;  %v1508_v12 = vld [vmem:[%s2147_s3 + $0x1f0] ss:$8 sps:$4 sm:$0xff]   ;;  %v1516_v14 = vld [vmem:[%s2147_s3 + $0x1e4] ss:$8 sps:$4 sm:$0xff]   ;;  %v1512_v15 = vld [vmem:[%s2147_s3 + $0x94] ss:$8 sps:$4 sm:$0xff]  }
  0x19   :  { %1254 = vmatmul.mubr.msk.bf16.vlgmr.msra.gmra.mxu0 %vm276_vm0, %v119_v25  ;;  %v85_v7 = vcombine.high %v62_v0, %v76_v1  ;;  %v1514_v16 = vld [vmem:[%s2147_s3 + $0x1e0] ss:$8 sps:$4 sm:$0xff]   ;;  %v1517_v17 = vld [vmem:[%s2147_s3 + $0x90] ss:$8 sps:$4 sm:$0xff]   ;;  %v1522_v18 = vld [vmem:[%s2147_s3 + $0x1d4] ss:$8 sps:$4 sm:$0xff]   ;;  %v84_v21 = vcombine.low %v62_v0, %v76_v1 }
  0x1a   :  { %843 = vmatpush1.bf16.msra.mxu0 %v1460_v26  ;;  %812 = vmatpush1.bf16.msra.mxu1 %v1463_v27  ;;  %v87_v8 = vcombine.high %v1875_v2, %v1878_v3  ;;  %v1518_v19 = vld [vmem:[%s2147_s3 + $0x84] ss:$8 sps:$4 sm:$0xff]   ;;  %v1520_v20 = vld [vmem:[%s2147_s3 + $0x1d0] ss:$8 sps:$4 sm:$0xff]   ;;  %v1523_v22 = vld [vmem:[%s2147_s3 + $0x80] ss:$8 sps:$4 sm:$0xff]   ;;  %v86_v49 = vcombine.low %v1875_v2, %v1878_v3 }
  0x1b   :  { %844 = vmatprep.subr.bf16.mxu0 %v1468_v28  ;;  %813 = vmatprep.subr.bf16.mxu1 %v1464_v29  ;;  %v113_v10 = vpack.c.bf16 %v85_v7, %v85_v7  ;;  %v1532_v23 = vld [vmem:[%s2147_s3 + $0x1c4] ss:$8 sps:$4 sm:$0xff]   ;;  %v1535_v24 = vld [vmem:[%s2147_s3 + $0x274] ss:$8 sps:$4 sm:$0xff]   ;;  %v112_v25 = vpack.c.bf16 %v84_v21, %v84_v21  ;;  %v1530_v26 = vld [vmem:[%s2147_s3 + $0x1c0] ss:$8 sps:$4 sm:$0xff]  }
  0x1c   :  { %v115_v11 = vpack.c.bf16 %v87_v8, %v87_v8  ;;  %v1533_v27 = vld [vmem:[%s2147_s3 + $0x270] ss:$8 sps:$4 sm:$0xff]   ;;  %v1538_v28 = vld [vmem:[%s2147_s3 + $0x1b4] ss:$8 sps:$4 sm:$0xff]   ;;  %v1541_v29 = vld [vmem:[%s2147_s3 + $0x264] ss:$8 sps:$4 sm:$0xff]  }
  0x1d   :  { %833 = vmatprep.mubr.bf16.mxu1 %v113_v10  ;;  %v1594_v42 = vld [vmem:[%s2145_s1 + $0x20] ss:$12 sps:$4 sm:$0xff]   ;;  %v1559_v43 = vld [vmem:[%s2147_s3 + $0x234] ss:$8 sps:$4 sm:$0xff]   ;;  %v1569_v61 = vld [vmem:[%s2147_s3 + $0x2f0] ss:$8 sps:$4 sm:$0xff]  }
  0x1e   :  { %845 = vmatpush1.bf16.msra.mxu0 %v1466_v30  ;;  %814 = vmatpush1.bf16.msra.mxu1 %v1469_v31  ;;  %v1536_v30 = vld [vmem:[%s2147_s3 + $0x1b0] ss:$8 sps:$4 sm:$0xff]   ;;  %v1539_v31 = vld [vmem:[%s2147_s3 + $0x260] ss:$8 sps:$4 sm:$0xff]   ;;  %v1571_v60 = vld [vmem:[%s2147_s3 + $0x2f4] ss:$8 sps:$4 sm:$0xff]  }
  0x1f   :  { %846 = vmatprep.subr.bf16.mxu0 %v1474_v32  ;;  %815 = vmatprep.subr.bf16.mxu1 %v1470_v33  ;;  %v1544_v32 = vld [vmem:[%s2147_s3 + $0x1a4] ss:$8 sps:$4 sm:$0xff]   ;;  %v1547_v33 = vld [vmem:[%s2147_s3 + $0x254] ss:$8 sps:$4 sm:$0xff]   ;;  %v1566_v59 = vld [vmem:[%s2147_s3 + $0x200] ss:$8 sps:$4 sm:$0xff]  }
  0x20   :  { %874 = vmatprep.mubr.bf16.mxu0 %v115_v11  ;;  %v1574_v62 = vld [vmem:[%s2147_s3 + $0x2e4] ss:$8 sps:$4 sm:$0xff]   ;;  %v1577_v0 = vld [vmem:[%s2147_s3 + $0x2d4] ss:$8 sps:$4 sm:$0xff]   ;;  %v1575_v1 = vld [vmem:[%s2147_s3 + $0x2d0] ss:$8 sps:$4 sm:$0xff]  }
  0x21   :  { %v1580_v2 = vld [vmem:[%s2147_s3 + $0x2c4] ss:$8 sps:$4 sm:$0xff]   ;;  %v1578_v3 = vld [vmem:[%s2147_s3 + $0x2c0] ss:$8 sps:$4 sm:$0xff]   ;;  %v1589_v8 = vld [vmem:[%s2147_s3 + $0x294] ss:$8 sps:$4 sm:$0xff]  }
  0x22   :  { %847 = vmatpush1.bf16.msra.mxu0 %v1472_v34  ;;  %816 = vmatpush1.bf16.msra.mxu1 %v1475_v35  ;;  %v1542_v34 = vld [vmem:[%s2147_s3 + $0x1a0] ss:$8 sps:$4 sm:$0xff]   ;;  %v1545_v35 = vld [vmem:[%s2147_s3 + $0x250] ss:$8 sps:$4 sm:$0xff]   ;;  %v1592_v10 = vld [vmem:[%s2147_s3 + $0x284] ss:$8 sps:$4 sm:$0xff]  }
  0x23   :  { %848 = vmatprep.subr.bf16.mxu0 %v1480_v36  ;;  %817 = vmatprep.subr.bf16.mxu1 %v1476_v37  ;;  %v1550_v36 = vld [vmem:[%s2147_s3 + $0x194] ss:$8 sps:$4 sm:$0xff]   ;;  %v1553_v37 = vld [vmem:[%s2147_s3 + $0x244] ss:$8 sps:$4 sm:$0xff]   ;;  %v1584_v7 = vld [vmem:[%s2147_s3 + $0x2a0] ss:$8 sps:$4 sm:$0xff]  }
  0x24   :  { %v1602_v21 = vld [vmem:[%s2149_s5 + $0x20] sm:$0xff]   ;;  %vm1644_vm1 = vmmov 0   ;;  %vm1133_vm2 = vcmask 523264   ;;  %vm1226_vm4 = vcmask 15360  }
  0x26   :  { %849 = vmatpush1.bf16.msra.mxu0 %v1478_v38  ;;  %818 = vmatpush2.bf16.msra.mxu1 %v1481_v39  ;;  %v1548_v38 = vld [vmem:[%s2147_s3 + $0x190] ss:$8 sps:$4 sm:$0xff]   ;;  %v1551_v39 = vld [vmem:[%s2147_s3 + $0x240] ss:$8 sps:$4 sm:$0xff]  }
  0x27   :  { %850 = vmatprep.subr.bf16.mxu0 %v1486_v40  ;;  %819 = vmatprep.subr.bf16.mxu1 %v1482_v41  ;;  %v1556_v40 = vld [vmem:[%s2147_s3 + $0x184] ss:$8 sps:$4 sm:$0xff]   ;;  %v1593_v41 = vld [vmem:[%s2145_s1 + $0x8] ss:$12 sps:$4 sm:$0xff]  }
  0x2a   :  { %851 = vmatpush1.bf16.msra.mxu0 %v1484_v45  ;;  %820 = vmatpush2.bf16.msra.mxu1 %v1487_v46  ;;  %v96_v45 = vrot.slane %v1593_v41, %v1849_v56  ;;  %v103_v46 = vrot.slane %v1594_v42, %v1849_v56  ;;  %v1565_v56 = vld [vmem:[%s2147_s3 + $0x214] ss:$8 sps:$4 sm:$0xff]   ;;  %v928_v42 = vsub.s32 0, %v1831_v50 }
  0x2b   :  { %852 = vmatprep.subr.bf16.mxu0 %v1492_v47  ;;  %821 = vmatprep.subr.bf16.mxu1 %v1488_v48  ;;  %v1554_v47 = vld [vmem:[%s2147_s3 + $0x180] ss:$8 sps:$4 sm:$0xff]   ;;  %v1557_v48 = vld [vmem:[%s2147_s3 + $0x230] ss:$8 sps:$4 sm:$0xff]  }
  0x2c   :  { %v104_v11 = vcombine.low %v96_v45, %v103_v46 }
  0x2e   :  { %853 = vmatpush1.bf16.msra.mxu0 %v1490_v51  ;;  %822 = vmatpush2.bf16.msra.mxu1 %v1493_v52  ;;  %v105_v51 = vcombine.high %v96_v45, %v103_v46  ;;  %v1562_v52 = vld [vmem:[%s2147_s3 + $0x224] ss:$8 sps:$4 sm:$0xff]   ;;  %v932_v46 = vsub.s32 1, %v1831_v50  ;;  %v1643_v50 = vmov 0.0  }
  0x2f   :  { %854 = vmatprep.subr.bf16.mxu0 %v1498_v53  ;;  %823 = vmatprep.subr.bf16.mxu1 %v1494_v54  ;;  %v114_v54 = vpack.c.bf16 %v86_v49, %v86_v49 }
  0x30   :  { %v117_v53 = vpack.c.bf16 %v105_v51, %v105_v51 }
  0x32   :  { %855 = vmatpush1.bf16.msra.mxu0 %v1496_v55  ;;  %824 = vmatpush2.bf16.msra.mxu1 %v1499_v57  ;;  %v1560_v55 = vld [vmem:[%s2147_s3 + $0x220] ss:$8 sps:$4 sm:$0xff]   ;;  %v1563_v57 = vld [vmem:[%s2147_s3 + $0x210] ss:$8 sps:$4 sm:$0xff]  }
  0x33   :  { %856 = vmatprep.subr.bf16.mxu0 %v1504_v58  ;;  %825 = vmatprep.subr.bf16.mxu1 %v1500_v63  ;;  %v1568_v58 = vld [vmem:[%s2147_s3 + $0x204] ss:$8 sps:$4 sm:$0xff]   ;;  %v1572_v63 = vld [vmem:[%s2147_s3 + $0x2e0] ss:$8 sps:$4 sm:$0xff]  }
  0x36   :  { %857 = vmatpush1.bf16.msra.mxu0 %v1502_v4  ;;  %826 = vmatpush2.bf16.msra.mxu1 %v1505_v5  ;;  %v1583_v4 = vld [vmem:[%s2147_s3 + $0x2b4] ss:$8 sps:$4 sm:$0xff]   ;;  %v1581_v5 = vld [vmem:[%s2147_s3 + $0x2b0] ss:$8 sps:$4 sm:$0xff]  }
  0x37   :  { %858 = vmatprep.subr.bf16.mxu0 %v1510_v6  ;;  %827 = vmatprep.subr.bf16.mxu1 %v1506_v9  ;;  %v1586_v6 = vld [vmem:[%s2147_s3 + $0x2a4] ss:$8 sps:$4 sm:$0xff]   ;;  %v1587_v9 = vld [vmem:[%s2147_s3 + $0x290] ss:$8 sps:$4 sm:$0xff]  }
  0x3a   :  { %859 = vmatpush2.bf16.msra.mxu0 %v1508_v12  ;;  %828 = vmatpush2.bf16.msra.mxu1 %v1511_v13  ;;  %v1590_v12 = vld [vmem:[%s2147_s3 + $0x280] ss:$8 sps:$4 sm:$0xff]   ;;  %v116_v13 = vpack.c.bf16 %v104_v11, %v104_v11 }
  0x3b   :  { %860 = vmatprep.subr.bf16.mxu0 %v1516_v14  ;;  %829 = vmatprep.subr.bf16.mxu1 %v1512_v15  ;;  %v1595_v14 = vld [vmem:[%s2149_s5 + $0x78] sm:$0xff]  }
  0x3c   :  { %v1596_v15 = vld [vmem:[%s2149_s5 + $0x38] sm:$0xff]  }
  0x3e   :  { %861 = vmatpush2.bf16.msra.mxu0 %v1514_v16  ;;  %830 = vmatpush2.bf16.msra.mxu1 %v1517_v17  ;;  %v1597_v16 = vld [vmem:[%s2149_s5 + $0x70] sm:$0xff]  }
  0x3f   :  { %862 = vmatprep.subr.bf16.mxu0 %v1522_v18  ;;  %831 = vmatprep.subr.bf16.mxu1 %v1518_v19  ;;  %v1598_v17 = vld [vmem:[%s2149_s5 + $0x30] sm:$0xff]   ;;  %v1599_v18 = vld [vmem:[%s2149_s5 + $0x68] sm:$0xff]  }
  0x40   :  { %v1600_v19 = vld [vmem:[%s2149_s5 + $0x28] sm:$0xff]  }
  0x42   :  { %863 = vmatpush2.bf16.msra.mxu0 %v1520_v20  ;;  %832 = vmatpush2.bf16.msra.mxu1 %v1523_v22  ;;  %v1601_v20 = vld [vmem:[%s2149_s5 + $0x60] sm:$0xff]   ;;  %v1603_v22 = vld [vmem:[%s2149_s5 + $0x58] sm:$0xff]  }
  0x43   :  { %864 = vmatprep.subr.bf16.mxu0 %v1532_v23  ;;  %883 = vmatprep.subr.bf16.mxu1 %v1535_v24  ;;  %v1604_v23 = vld [vmem:[%s2149_s5 + $0x18] sm:$0xff]   ;;  %v1605_v24 = vld [vmem:[%s2149_s5 + $0x50] sm:$0xff]  }
  0x45   :  { %834 = vmatmul.mubr.bf16.vlgmr.msra.gmra.mxu1 %v112_v25  ;;  %v1606_v25 = vld [vmem:[%s2149_s5 + $0x10] sm:$0xff]  }
  0x46   :  { %865 = vmatpush2.bf16.msra.mxu0 %v1530_v26  ;;  %884 = vmatpush1.bf16.msra.mxu1 %v1533_v27  ;;  %v1607_v26 = vld [vmem:[%s2149_s5 + $0x48] sm:$0xff]  }
  0x47   :  { %866 = vmatprep.subr.bf16.mxu0 %v1538_v28  ;;  %885 = vmatprep.subr.bf16.mxu1 %v1541_v29  ;;  %v1608_v27 = vld [vmem:[%s2149_s5 + $0x8] sm:$0xff]   ;;  %v1609_v28 = vld [vmem:[%s2149_s5 + $0x40] sm:$0xff]  }
  0x48   :  { %915 = vmatprep.mubr.bf16.mxu1 %v117_v53 }
  0x4a   :  { %867 = vmatpush2.bf16.msra.mxu0 %v1536_v30  ;;  %886 = vmatpush1.bf16.msra.mxu1 %v1539_v31  ;;  %v1610_v30 = vld [vmem:[%s2149_s5] sm:$0xff]  }
  0x4b   :  { %868 = vmatprep.subr.bf16.mxu0 %v1544_v32  ;;  %887 = vmatprep.subr.bf16.mxu1 %v1547_v33 }
  0x4e   :  { %869 = vmatpush2.bf16.msra.mxu0 %v1542_v34  ;;  %888 = vmatpush1.bf16.msra.mxu1 %v1545_v35 }
  0x4f   :  { %870 = vmatprep.subr.bf16.mxu0 %v1550_v36  ;;  %889 = vmatprep.subr.bf16.mxu1 %v1553_v37 }
  0x52   :  { %871 = vmatpush2.bf16.msra.mxu0 %v1548_v38  ;;  %890 = vmatpush1.bf16.msra.mxu1 %v1551_v39 }
  0x53   :  { %872 = vmatprep.subr.bf16.mxu0 %v1556_v40  ;;  %891 = vmatprep.subr.bf16.mxu1 %v1559_v43  ;;  %v924_v43 = vld [vmem:[%s2148_s4] sm:$0x3] }
  0x54   :  { %v929_v49 = vrot.slane %v924_v43, %v928_v42 }
  0x56   :  { %873 = vmatpush2.bf16.msra.mxu0 %v1554_v47  ;;  %892 = vmatpush1.bf16.msra.mxu1 %v1557_v48 }
  0x57   :  { %893 = vmatprep.subr.bf16.mxu1 %v1562_v52  ;;  %1370 = vmatprep.subr.bf16.mxu0 %v1595_v14 }
  0x59   :  { %875 = vmatmul.mubr.bf16.vlgmr.msra.gmra.mxu0 %v114_v54  ;;  %v933_v54 = vrot.slane %v924_v43, %v932_v46 }
  0x5a   :  { %894 = vmatpush1.bf16.msra.mxu1 %v1560_v55  ;;  %1371 = vmatpush3.bf16.msra.mxu0 %v1596_v15 }
  0x5b   :  { %895 = vmatprep.subr.bf16.mxu1 %v1565_v56  ;;  %1372 = vmatprep.subr.bf16.mxu0 %v1597_v16 }
  0x5e   :  { %896 = vmatpush1.bf16.msra.mxu1 %v1563_v57  ;;  %1373 = vmatpush3.bf16.msra.mxu0 %v1598_v17  ;;  %v1368_v17 = vld [vmem:[#allocation2] ss:$0 sm:$0xff] }
  0x5f   :  { %897 = vmatprep.subr.bf16.mxu1 %v1568_v58  ;;  %1374 = vmatprep.subr.bf16.mxu0 %v1599_v18 }
  0x62   :  { %898 = vmatpush1.bf16.msra.mxu1 %v1566_v59  ;;  %1375 = vmatpush3.bf16.msra.mxu0 %v1600_v19 }
  0x63   :  { %899 = vmatprep.subr.bf16.mxu1 %v1571_v60  ;;  %1376 = vmatprep.subr.bf16.mxu0 %v1601_v20 }
  0x66   :  { %900 = vmatpush2.bf16.msra.mxu1 %v1569_v61  ;;  %1377 = vmatpush3.bf16.msra.mxu0 %v1602_v21 }
  0x67   :  { %901 = vmatprep.subr.bf16.mxu1 %v1574_v62  ;;  %1378 = vmatprep.subr.bf16.mxu0 %v1603_v22 }
  0x6a   :  { %902 = vmatpush2.bf16.msra.mxu1 %v1572_v63  ;;  %1379 = vmatpush3.bf16.msra.mxu0 %v1604_v23 }
  0x6b   :  { %903 = vmatprep.subr.bf16.mxu1 %v1577_v0  ;;  %1380 = vmatprep.subr.bf16.mxu0 %v1605_v24 }
  0x6e   :  { %904 = vmatpush2.bf16.msra.mxu1 %v1575_v1  ;;  %1381 = vmatpush3.bf16.msra.mxu0 %v1606_v25  ;;  %v1125_v1 = vld [vmem:[%s2151_s7 + $0x38] sm:$0xff] }
  0x6f   :  { %905 = vmatprep.subr.bf16.mxu1 %v1580_v2  ;;  %1382 = vmatprep.subr.bf16.mxu0 %v1607_v26  ;;  %v1124_v2 = vld [vmem:[%s2151_s7 + $0x30] sm:$0xff]  ;;  %v1212_v26 = vand.u32 127, %v59_v44 }
  0x71   :  { %vm1213_vm3 = vcmp.eq.s32.totalorder %v1212_v26, 1 }
  0x72   :  { %906 = vmatpush2.bf16.msra.mxu1 %v1578_v3  ;;  %1383 = vmatpush3.bf16.msra.mxu0 %v1608_v27  ;;  %v1123_v3 = vld [vmem:[%s2151_s7 + $0x28] sm:$0xff] }
  0x73   :  { %907 = vmatprep.subr.bf16.mxu1 %v1583_v4  ;;  %1384 = vmatprep.subr.bf16.mxu0 %v1609_v28  ;;  %v1122_v4 = vld [vmem:[%s2151_s7 + $0x20] sm:$0xff] }
  0x76   :  { %908 = vmatpush2.bf16.msra.mxu1 %v1581_v5  ;;  %1385 = vmatpush3.bf16.msra.mxu0 %v1610_v30  ;;  %v1121_v5 = vld [vmem:[%s2151_s7 + $0x18] sm:$0xff] }
  0x77   :  { %909 = vmatprep.subr.bf16.mxu1 %v1586_v6  ;;  %1401 = vmatprep.subr.mxu0 %v1643_v50  ;;  %v1120_v6 = vld [vmem:[%s2151_s7 + $0x10] sm:$0xff] }
  0x7a   :  { %910 = vmatpush2.bf16.msra.mxu1 %v1584_v7  ;;  %v1119_v7 = vld [vmem:[%s2151_s7 + $0x8] sm:$0xff] }
  0x7b   :  { %911 = vmatprep.subr.bf16.mxu1 %v1589_v8  ;;  %v1118_v8 = vld [vmem:[%s2151_s7] sm:$0xff] }
  0x7e   :  { %912 = vmatpush2.bf16.msra.mxu1 %v1587_v9 }
  0x7f   :  { %913 = vmatprep.subr.bf16.mxu1 %v1592_v10  ;;  %v1351_v10 = vld [vmem:[%s2150_s6] ss:$0 sm:$0xff] }
  0x82   :  { %914 = vmatpush2.bf16.msra.mxu1 %v1590_v12 }
  0x85   :  { %916 = vmatmul.mubr.bf16.vlgmr.msra.gmra.mxu1 %v116_v13 }
  0xd9   :  { %v314_v29 = vpop.f32.mrf.mxu0 }
  0xdb   :  { %v316_v31 = vpop.f32.mrf.mxu0 }
  0xdd   :  { %v318_v32 = vpop.f32.mrf.mxu0 }
  0xdf   :  { %v319_v33 = vpop.f32.mrf.mxu0 }
 0x105   :  { %v835_v34 = vpop.f32.mrf.mxu1 }
 0x106   :  { %v836_v45 = vadd.f32 %v835_v34, %v314_v29 }
 0x107   :  { %v837_v35 = vpop.f32.mrf.mxu1 }
 0x108   :  { %v838_v47 = vadd.f32 %v837_v35, %v316_v31 }
 0x109   :  { %v839_v36 = vpop.f32.mrf.mxu1 }
 0x10b   :  { %v840_v37 = vpop.f32.mrf.mxu1 }
 0x119   :  { %v876_v38 = vpop.f32.mrf.mxu0 }
 0x11a   :  { %v877_v48 = vadd.f32 %v876_v38, %v836_v45 }
 0x11b   :  { %v878_v39 = vpop.f32.mrf.mxu0 }
 0x11c   :  { %v879_v52 = vadd.f32 %v878_v39, %v838_v47 }
 0x11d   :  { %v880_v40 = vpop.f32.mrf.mxu0 }
 0x11f   :  { %v881_v41 = vpop.f32.mrf.mxu0 }
 0x145   :  { %v917_v51 = vpop.f32.mrf.mxu1 }
 0x146   :  { %v918_v53 = vadd.f32 %v917_v51, %v877_v48 }
 0x147   :  { %v919_v55 = vpop.f32.mrf.mxu1 }
 0x148   :  { %v936_v56 = vadd.f32 %v929_v49, %v918_v53  ;;  %v920_v57 = vadd.f32 %v919_v55, %v879_v52 }
 0x149   :  { %v921_v58 = vpop.f32.mrf.mxu1 }
 0x14a   :  { %v937_v59 = vadd.f32 %v933_v54, %v920_v57  ;;  %1611 = vtanh.f32 %v936_v56 }
 0x14b   :  { %v922_v60 = vpop.f32.mrf.mxu1 }
 0x14c   :  { %1613 = vtanh.f32 %v937_v59 }
 0x157   :  { %v1612_v61 = vpop.eup %1611 }
 0x158   :  { %v940_v0 = vpack.c.bf16 %v1612_v61, %v1612_v61 }
 0x159   :  { %v1614_v62 = vpop.eup %1613 }
 0x15a   :  { %v941_v63 = vpack.c.bf16 %v1614_v62, %v1614_v62 }
 0x15c   :  { %1109 = vmatprep.mubr.bf16.mxu0 %v941_v63 }
 0x15d   :  { %1110 = vmatmul.mubr.bf16.vlgmr.msra.gmra.mxu0 %v940_v0 }
 0x15e   :  { %1402 = vmatpush3.msra.mxu0 %v1125_v1  ;;  %1417 = vmatprep.mubr.msk.f32.mxu0 %vm1644_vm1, %v1643_v50 }
 0x15f   :  { %1403 = vmatprep.subr.mxu0 %v1643_v50 }
 0x160   :  { %1404 = vmatpush3.msra.mxu0 %v1124_v2 }
 0x161   :  { %1405 = vmatprep.subr.mxu0 %v1643_v50 }
 0x162   :  { %1406 = vmatpush3.msra.mxu0 %v1123_v3 }
 0x163   :  { %1407 = vmatprep.subr.mxu0 %v1643_v50 }
 0x164   :  { %1408 = vmatpush3.msra.mxu0 %v1122_v4 }
 0x165   :  { %1409 = vmatprep.subr.mxu0 %v1643_v50 }
 0x166   :  { %1410 = vmatpush3.msra.mxu0 %v1121_v5 }
 0x167   :  { %1411 = vmatprep.subr.mxu0 %v1643_v50 }
 0x168   :  { %1412 = vmatpush3.msra.mxu0 %v1120_v6 }
 0x169   :  { %1413 = vmatprep.subr.mxu0 %v1643_v50 }
 0x16a   :  { %1414 = vmatpush3.msra.mxu0 %v1119_v7 }
 0x16b   :  { %1415 = vmatprep.subr.mxu0 %v1643_v50 }
 0x16c   :  { %1416 = vmatpush3.msra.mxu0 %v1118_v8 }
 0x21d   :  { %v1386_v9 = vpop.f32.mrf.mxu0 }
 0x21f   :  { %v1387_v11 = vpop.f32.mrf.mxu0 }
 0x220   :  { %v1388_v12 = vadd.f32 %v1387_v11, %v1386_v9 }
 0x221   :  { %v1389_v13 = vpop.f32.mrf.mxu0 }
 0x222   :  { %v1112_v14 = vadd.f32 %v1388_v12, %v1351_v10 }
 0x223   :  { %v1390_v15 = vpop.f32.mrf.mxu0 }
 0x224   :  { %1615 = vtanh.f32 %v1112_v14 }
 0x231   :  { %v1616_v16 = vpop.eup %1615 }
 0x232   :  { %1418 = vmatmul.mubr.msk.f32.vlgmr.msra.gmra.mxu0 %vm1133_vm2, %v1616_v16 }
 0x2f2   :  { %v1203_v18 = vpop.f32.mrf.mxu0 }
 0x2f3   :  { %v1204_v19 = vadd.f32 %v1368_v17, %v1203_v18 }
 0x2f4   :  { %v1419_v20 = vpop.f32.mrf.mxu0 }
 0x2f5   :  { %v1207_v21 = vmul.f32 0.5, %v1204_v19 }
 0x2f7   :  { %1617 = vtanh.f32 %v1207_v21 }
 0x304   :  { %v1618_v22 = vpop.eup %1617 }
 0x305   :  { %v1209_v23 = vadd.f32 1.0, %v1618_v22 }
 0x307   :  { %v1210_v24 = vmul.f32 0.5, %v1209_v23 }
 0x309   :  { %1217 = vperm.xlu0 %1427, %v1210_v24   ;;  %v1214_v25 = vsub.f32 1.0, %v1210_v24 }
 0x30d   :  { %1222 = vperm.xlu0 %1427, %v1214_v25  }
 0x384   :  { %v1218_v27 = vpop.permute.xlu0 %1217 }
 0x388   :  { %v1223_v28 = vpop.permute.xlu0 %1222 }
 0x389   :  { %v1225_v29 = vsel %vm1213_vm3, %v1218_v27, %v1223_v28 }
 0x38a   :  { %1227 = vst.msk [vmem:[#allocation3] sm:$0xff] %vm1226_vm4, %v1225_v29 }
 0x38b   :  { %1232 = vsyncadd [#allocation4], 96  ;;  %s1645_s6 = smov [#allocation3]  }
 0x38c   :  { %s1233_s7 = sshll.u32 %s1645_s6, 4  ;;  %s1234_s7 = int_to_ptr.vmem [resolvable:$true] %s1233_s7 }
 0x38d   :  { %s1619_s8 = scalar_lea.vmem %s1234_s7, 32  ;;  %s1623_s19 = scalar_lea.vmem %s1234_s7, 128 }
 0x38e   :  { %p1620_p0 = scmp.ne.s32.totalorder %s1234_s7, %s1619_s8  ;;  %p1624_p1 = scmp.lt.s32.totalorder %s1234_s7, %s1234_s7 }
 0x38f   :  { %p1625_p2 = scmp.lt.s32.totalorder %s1623_s19, %s1619_s8 }
 0x391   :  { %p1626_p3 = por %p1625_p2, %p1624_p1 }
 0x393   :  { %p1627_p4 = pnand %p1626_p3, %p1620_p0 }
 0x395   :  { %1630 = shalt.err (!%p1627_p4)
}
 0x396   :  { %s1646_s20 = smov 32   ;;  %s1647_s21 = smov 2  }
 0x397   :  { %1239 = dma.vmem_to_hbm [thread:$0]  %s1234_s7, 32, %s2153_s9, [#allocation4], %s1646_s20, %s1646_s20, %s1647_s21  }
 0x398   :  { %1639 = dma.done.wait [#allocation4], 128  }
 0x399   :  { %1640 = vsyncadd [#allocation4], 4294967168 }
 0x39a   :  { %1243 = vsyncpa [#allocation4], 1 }

</bundles_post_ra>
